<compile_context>
chip_gen: v7x
topology: tpu7x:2x2x1
jax: 0.10.0
libtpu: 0.0.40
codegen_flags: <defaults>
</compile_context>

<pallas_src>
import functools

import jax
import jax.numpy as jnp
from jax import lax
from jax.experimental import pallas as pl
from jax.experimental.pallas import tpu as pltpu


def _basic_block_kernel(x_ref, w1_ref, w2_ref, b1_ref, b2_ref, out_ref, *, W):
    # x_ref:   (NB, Cp, H*W)   f32, channels-first flattened spatial (Cp % 8 == 0)
    # w1_ref:  (Cp, 9*Cp)      bf16 conv1 taps with bn1 scale folded in
    # w2_ref:  (Cp, 9*Cp)      bf16 conv2 taps with bn2 scale folded in
    # b1/b2:   (Cp, 1)         f32 folded BN bias
    # out_ref: (NB, Cp, H*W)   f32
    NB, Cp, HW = x_ref.shape

    # Horizontal-wrap masks: computed once, reused for both convs and all NB items.
    col = lax.broadcasted_iota(jnp.int32, (1, HW), 1) % W  # lane position within a row
    left_ok = col >= 1          # valid when kw offset == -1
    right_ok = col <= W - 2     # valid when kw offset == +1

    def im2col(xf):
        """(Cp, HW) bf16 -> (9*Cp, HW) bf16; row r = (kh*3+kw)*Cp + c."""
        zpad = jnp.zeros((Cp, W + 1), xf.dtype)
        xz = jnp.concatenate([zpad, xf, zpad], axis=1)       # (Cp, HW + 2W + 2)
        rows = []
        for kh in range(3):
            for kw in range(3):
                off = (kh - 1) * W + (kw - 1) + (W + 1)       # static lane offset
                s = xz[:, off:off + HW]                       # (Cp, HW)
                # Vertical OOB already reads the zero pad; only horizontal wrap
                # across image rows needs masking.
                if kw == 0:
                    s = jnp.where(left_ok, s, jnp.zeros_like(s))
                elif kw == 2:
                    s = jnp.where(right_ok, s, jnp.zeros_like(s))
                rows.append(s)
        return jnp.concatenate(rows, axis=0)                  # (9*Cp, HW)

    # ---- conv1 + bn1 + tanh1 : one (Cp, 9*Cp) @ (9*Cp, NB*HW) MXU matmul ----------
    p1 = [im2col(x_ref[n].astype(jnp.bfloat16)) for n in range(NB)]   # static tiny loop
    P1 = p1[0] if NB == 1 else jnp.concatenate(p1, axis=1)            # (9*Cp, NB*HW)
    acc1 = jnp.dot(w1_ref[...], P1, preferred_element_type=jnp.float32)
    out1 = jnp.tanh(acc1 + b1_ref[...])                               # (Cp, NB*HW) f32

    # ---- conv2 (per-item im2col so the halo never leaks across batch items) --------
    out1_bf = out1.astype(jnp.bfloat16)
    p2 = [im2col(out1_bf[:, n * HW:(n + 1) * HW]) for n in range(NB)]
    P2 = p2[0] if NB == 1 else jnp.concatenate(p2, axis=1)            # (9*Cp, NB*HW)
    acc2 = jnp.dot(w2_ref[...], P2, preferred_element_type=jnp.float32)

    # ---- epilogue: bn2 bias + residual (re-read from VMEM-resident x) + tanh2 ------
    for n in range(NB):
        res = x_ref[n]                                                # (Cp, HW) f32
        out_ref[n] = jnp.tanh(acc2[:, n * HW:(n + 1) * HW] + b2_ref[...] + res)


def basic_block_forward(x_nchw, params, eps=1e-5, batch_block=1):
    """Pallas BasicBlock forward. Input/output are NCHW like the PyTorch module.

    batch_block: items fused per grid step. Requires H*W % 128 == 0 when > 1.
    Guidance: keep N // batch_block >= 2 on v7x (2 TCs); on single-TC v5e/v6e use the
    largest batch_block that fits VMEM.
    """
    N, Cin, H, W = x_nchw.shape
    w1_oihw = params["conv1_w"]
    w2_oihw = params["conv2_w"]
    Cout = w1_oihw.shape[0]
    assert Cin == Cout, "BasicBlock with downsample=None requires in_channel == out_channel"
    NB = batch_block
    assert N % NB == 0
    HW = H * W
    if NB > 1:
        assert HW % 128 == 0, "lane-concat of batch items needs H*W % 128 == 0; use batch_block=1"

    # Sublane-align channels (zero-pad to a multiple of 8).
    Cp = -(-Cin // 8) * 8

    # NCHW -> (N, Cp, H*W): reshape is free, only the channel zero-pad costs anything.
    x = x_nchw.astype(jnp.float32).reshape(N, Cin, HW)
    if Cp != Cin:
        x = jnp.pad(x, ((0, 0), (0, Cp - Cin), (0, 0)))

    def fold_bn(gamma, beta, mean, var):
        s = gamma.astype(jnp.float32) / jnp.sqrt(var.astype(jnp.float32) + eps)
        b = beta.astype(jnp.float32) - mean.astype(jnp.float32) * s
        return s, b

    s1, b1 = fold_bn(params["bn1_gamma"], params["bn1_beta"],
                     params["bn1_mean"], params["bn1_var"])
    s2, b2 = fold_bn(params["bn2_gamma"], params["bn2_beta"],
                     params["bn2_mean"], params["bn2_var"])

    def prep_w(w_oihw, scale):
        # OIHW -> (O, kh, kw, I); fold the BN scale into each output row in f32,
        # zero-pad O and I to Cp, flatten to (Cp, 9*Cp), cast bf16 for the MXU.
        O, I = w_oihw.shape[0], w_oihw.shape[1]
        w = jnp.transpose(w_oihw.astype(jnp.float32), (0, 2, 3, 1))
        w = w * scale[:, None, None, None]
        w = jnp.pad(w, ((0, Cp - O), (0, 0), (0, 0), (0, Cp - I)))
        return w.reshape(Cp, 9 * Cp).astype(jnp.bfloat16)

    def prep_b(b):
        return jnp.pad(b, (0, Cp - b.shape[0])).reshape(Cp, 1).astype(jnp.float32)

    w1 = prep_w(w1_oihw, s1)
    w2 = prep_w(w2_oihw, s2)
    b1p = prep_b(b1)
    b2p = prep_b(b2)

    kernel = functools.partial(_basic_block_kernel, W=W)

    out = pl.pallas_call(
        kernel,
        out_shape=jax.ShapeDtypeStruct((N, Cp, HW), jnp.float32),
        grid_spec=pltpu.PrefetchScalarGridSpec(
            num_scalar_prefetch=0,
            grid=(N // NB,),
            in_specs=[
                pl.BlockSpec((NB, Cp, HW), lambda n: (n, 0, 0)),
                pl.BlockSpec((Cp, 9 * Cp), lambda n: (0, 0)),
                pl.BlockSpec((Cp, 9 * Cp), lambda n: (0, 0)),
                pl.BlockSpec((Cp, 1), lambda n: (0, 0)),
                pl.BlockSpec((Cp, 1), lambda n: (0, 0)),
            ],
            out_specs=pl.BlockSpec((NB, Cp, HW), lambda n: (n, 0, 0)),
        ),
        compiler_params=pltpu.CompilerParams(
            dimension_semantics=("parallel",),        # batch items independent -> megacore
            vmem_limit_bytes=48 * 1024 * 1024,        # fits v7x 64 MiB; > v5e/v6e defaults
        ),
    )(x, w1, w2, b1p, b2p)

    # Drop channel padding; already NCHW-flattened.
    return out[:, :Cout, :].reshape(N, Cout, H, W)


def basic_block_reference(x_nchw, params, eps=1e-5):
    """Pure-JAX reference (NCHW, same semantics as the PyTorch forward)."""
    def conv(x, w):
        return lax.conv_general_dilated(
            x, w, window_strides=(1, 1), padding=((1, 1), (1, 1)),
            dimension_numbers=("NCHW", "OIHW", "NCHW"))

    def bn(x, gamma, beta, mean, var):
        s = gamma / jnp.sqrt(var + eps)
        b = beta - mean * s
        return x * s[None, :, None, None] + b[None, :, None, None]

    out = jnp.tanh(bn(conv(x_nchw, params["conv1_w"]),
                      params["bn1_gamma"], params["bn1_beta"],
                      params["bn1_mean"], params["bn1_var"]))
    out = bn(conv(out, params["conv2_w"]),
             params["bn2_gamma"], params["bn2_beta"],
             params["bn2_mean"], params["bn2_var"])
    return jnp.tanh(out + x_nchw)


if __name__ == "__main__":
    N, C, H, W = 2, 4, 16, 16
    ks = jax.random.split(jax.random.PRNGKey(0), 11)
    params = {
        "conv1_w": 0.1 * jax.random.normal(ks[0], (C, C, 3, 3), jnp.float32),
        "conv2_w": 0.1 * jax.random.normal(ks[1], (C, C, 3, 3), jnp.float32),
        "bn1_gamma": 1.0 + 0.1 * jax.random.normal(ks[2], (C,), jnp.float32),
        "bn1_beta": 0.1 * jax.random.normal(ks[3], (C,), jnp.float32),
        "bn1_mean": 0.1 * jax.random.normal(ks[4], (C,), jnp.float32),
        "bn1_var": 1.0 + 0.1 * jax.random.uniform(ks[5], (C,), jnp.float32),
        "bn2_gamma": 1.0 + 0.1 * jax.random.normal(ks[6], (C,), jnp.float32),
        "bn2_beta": 0.1 * jax.random.normal(ks[7], (C,), jnp.float32),
        "bn2_mean": 0.1 * jax.random.normal(ks[8], (C,), jnp.float32),
        "bn2_var": 1.0 + 0.1 * jax.random.uniform(ks[9], (C,), jnp.float32),
    }
    x = jax.random.normal(ks[10], (N, C, H, W), jnp.float32)

    ref = jax.block_until_ready(basic_block_reference(x, params))

    # bf16 matmul operands with f32 accumulation -> loosened tolerance vs the f32 reference.
    TOL = 5e-2

    # Path 1 (default): one item per grid step -> grid length 2 keeps both v7x TCs busy.
    out1 = jax.block_until_ready(basic_block_forward(x, params, batch_block=1))
    assert out1.shape == (N, C, H, W), out1.shape
    err1 = float(jnp.max(jnp.abs(out1 - ref)))
    assert jnp.allclose(out1, ref, atol=TOL, rtol=TOL), f"max abs err {err1}"

    # Path 2: whole batch in one grid step (single matmul pair per conv); exercises the
    # lane-concat path. Preferred on single-TC v5e/v6e; on v7x keep grid >= 2 instead.
    out2 = jax.block_until_ready(basic_block_forward(x, params, batch_block=N))
    err2 = float(jnp.max(jnp.abs(out2 - ref)))
    assert jnp.allclose(out2, ref, atol=TOL, rtol=TOL), f"max abs err {err2}"

    print("KERNEL_OK")
</pallas_src>

<mosaic_0001>
module attributes {stable_mosaic.version = 11 : i64} {
  func.func @_basic_block_kernel(%arg0: i32, %arg1: memref<1x8x256xf32, #tpu.memory_space<vmem>>, %arg2: memref<8x72xbf16, #tpu.memory_space<vmem>>, %arg3: memref<8x72xbf16, #tpu.memory_space<vmem>>, %arg4: memref<8x1xf32, #tpu.memory_space<vmem>>, %arg5: memref<8x1xf32, #tpu.memory_space<vmem>>, %arg6: memref<1x8x256xf32, #tpu.memory_space<vmem>>) attributes {dimension_semantics = [#tpu.dimension_semantics<parallel>], iteration_bounds = array<i64: 2>, scalar_prefetch = 0 : i64, scratch_operands = 0 : i64, tpu.core_type = #tpu.core_type<tc>, window_params = [{transform_indices = @transform_0, window_bounds = array<i64: 1, 8, 256>}, {pipeline_mode = #tpu.pipeline_mode<synchronous>, transform_indices = @transform_1, window_bounds = array<i64: 8, 72>}, {pipeline_mode = #tpu.pipeline_mode<synchronous>, transform_indices = @transform_2, window_bounds = array<i64: 8, 72>}, {pipeline_mode = #tpu.pipeline_mode<synchronous>, transform_indices = @transform_3, window_bounds = array<i64: 8, 1>}, {pipeline_mode = #tpu.pipeline_mode<synchronous>, transform_indices = @transform_4, window_bounds = array<i64: 8, 1>}, {transform_indices = @transform_5, window_bounds = array<i64: 1, 8, 256>}]} {
    %0 = tpu.iota {dimensions = array<i32: 1>} : vector<1x256xi32>
    %c16_i32 = arith.constant 16 : i32
    %c0_i32 = arith.constant 0 : i32
    %1 = arith.cmpi eq, %c16_i32, %c0_i32 : i32
    %c1_i32 = arith.constant 1 : i32
    %2 = arith.select %1, %c1_i32, %c16_i32 : i32
    %3 = vector.broadcast %2 : i32 to vector<1x256xi32>
    %4 = arith.remsi %0, %3 : vector<1x256xi32>
    %c0_i32_0 = arith.constant 0 : i32
    %5 = vector.broadcast %c0_i32_0 : i32 to vector<1x256xi32>
    %6 = arith.cmpi ne, %4, %5 : vector<1x256xi32>
    %c0_i32_1 = arith.constant 0 : i32
    %7 = vector.broadcast %c0_i32_1 : i32 to vector<1x256xi32>
    %8 = arith.cmpi slt, %4, %7 : vector<1x256xi32>
    %c0_i32_2 = arith.constant 0 : i32
    %9 = arith.cmpi slt, %2, %c0_i32_2 : i32
    %10 = vector.broadcast %9 : i1 to vector<1x256xi1>
    %11 = vector.broadcast %10 : vector<1x256xi1> to vector<1x256xi1>
    %12 = arith.xori %8, %11 : vector<1x256xi1>
    %13 = arith.andi %12, %6 : vector<1x256xi1>
    %14 = vector.broadcast %2 : i32 to vector<1x256xi32>
    %15 = arith.addi %4, %14 : vector<1x256xi32>
    %16 = arith.select %13, %15, %4 : vector<1x256xi1>, vector<1x256xi32>
    %c1_i32_3 = arith.constant 1 : i32
    %17 = vector.broadcast %c1_i32_3 : i32 to vector<1x256xi32>
    %18 = arith.cmpi sge, %16, %17 : vector<1x256xi32>
    %c14_i32 = arith.constant 14 : i32
    %19 = vector.broadcast %c14_i32 : i32 to vector<1x256xi32>
    %20 = arith.cmpi sle, %16, %19 : vector<1x256xi32>
    %c0 = arith.constant 0 : index
    %c0_4 = arith.constant 0 : index
    %c0_5 = arith.constant 0 : index
    %21 = vector.load %arg1[%c0, %c0_4, %c0_5] : memref<1x8x256xf32, #tpu.memory_space<vmem>>, vector<1x8x256xf32>
    %22 = vector.shape_cast %21 : vector<1x8x256xf32> to vector<8x256xf32>
    %23 = arith.truncf %22 : vector<8x256xf32> to vector<8x256xbf16>
    %cst = arith.constant 0.000000e+00 : bf16
    %24 = vector.broadcast %cst : bf16 to vector<8x17xbf16>
    %25 = tpu.concatenate %24, %23, %24 in 1 : vector<8x17xbf16>, vector<8x256xbf16>, vector<8x17xbf16> -> vector<8x290xbf16>
    %26 = vector.extract_strided_slice %25 {offsets = [0, 0], sizes = [8, 256], strides = [1, 1]} : vector<8x290xbf16> to vector<8x256xbf16>
    %cst_6 = arith.constant 0.000000e+00 : bf16
    %27 = vector.broadcast %cst_6 : bf16 to vector<8x256xbf16>
    %28 = vector.shape_cast %18 : vector<1x256xi1> to vector<1x256xi1>
    %29 = vector.broadcast %28 : vector<1x256xi1> to vector<8x256xi1>
    %30 = arith.select %29, %26, %27 : vector<8x256xi1>, vector<8x256xbf16>
    %31 = vector.extract_strided_slice %25 {offsets = [0, 1], sizes = [8, 256], strides = [1, 1]} : vector<8x290xbf16> to vector<8x256xbf16>
    %32 = vector.extract_strided_slice %25 {offsets = [0, 2], sizes = [8, 256], strides = [1, 1]} : vector<8x290xbf16> to vector<8x256xbf16>
    %cst_7 = arith.constant 0.000000e+00 : bf16
    %33 = vector.broadcast %cst_7 : bf16 to vector<8x256xbf16>
    %34 = vector.shape_cast %20 : vector<1x256xi1> to vector<1x256xi1>
    %35 = vector.broadcast %34 : vector<1x256xi1> to vector<8x256xi1>
    %36 = arith.select %35, %32, %33 : vector<8x256xi1>, vector<8x256xbf16>
    %37 = vector.extract_strided_slice %25 {offsets = [0, 16], sizes = [8, 256], strides = [1, 1]} : vector<8x290xbf16> to vector<8x256xbf16>
    %cst_8 = arith.constant 0.000000e+00 : bf16
    %38 = vector.broadcast %cst_8 : bf16 to vector<8x256xbf16>
    %39 = vector.shape_cast %18 : vector<1x256xi1> to vector<1x256xi1>
    %40 = vector.broadcast %39 : vector<1x256xi1> to vector<8x256xi1>
    %41 = arith.select %40, %37, %38 : vector<8x256xi1>, vector<8x256xbf16>
    %42 = vector.extract_strided_slice %25 {offsets = [0, 17], sizes = [8, 256], strides = [1, 1]} : vector<8x290xbf16> to vector<8x256xbf16>
    %43 = vector.extract_strided_slice %25 {offsets = [0, 18], sizes = [8, 256], strides = [1, 1]} : vector<8x290xbf16> to vector<8x256xbf16>
    %cst_9 = arith.constant 0.000000e+00 : bf16
    %44 = vector.broadcast %cst_9 : bf16 to vector<8x256xbf16>
    %45 = vector.shape_cast %20 : vector<1x256xi1> to vector<1x256xi1>
    %46 = vector.broadcast %45 : vector<1x256xi1> to vector<8x256xi1>
    %47 = arith.select %46, %43, %44 : vector<8x256xi1>, vector<8x256xbf16>
    %48 = vector.extract_strided_slice %25 {offsets = [0, 32], sizes = [8, 256], strides = [1, 1]} : vector<8x290xbf16> to vector<8x256xbf16>
    %cst_10 = arith.constant 0.000000e+00 : bf16
    %49 = vector.broadcast %cst_10 : bf16 to vector<8x256xbf16>
    %50 = vector.shape_cast %18 : vector<1x256xi1> to vector<1x256xi1>
    %51 = vector.broadcast %50 : vector<1x256xi1> to vector<8x256xi1>
    %52 = arith.select %51, %48, %49 : vector<8x256xi1>, vector<8x256xbf16>
    %53 = vector.extract_strided_slice %25 {offsets = [0, 33], sizes = [8, 256], strides = [1, 1]} : vector<8x290xbf16> to vector<8x256xbf16>
    %54 = vector.extract_strided_slice %25 {offsets = [0, 34], sizes = [8, 256], strides = [1, 1]} : vector<8x290xbf16> to vector<8x256xbf16>
    %cst_11 = arith.constant 0.000000e+00 : bf16
    %55 = vector.broadcast %cst_11 : bf16 to vector<8x256xbf16>
    %56 = vector.shape_cast %20 : vector<1x256xi1> to vector<1x256xi1>
    %57 = vector.broadcast %56 : vector<1x256xi1> to vector<8x256xi1>
    %58 = arith.select %57, %54, %55 : vector<8x256xi1>, vector<8x256xbf16>
    %59 = tpu.concatenate %30, %31, %36, %41, %42, %47, %52, %53, %58 in 0 : vector<8x256xbf16>, vector<8x256xbf16>, vector<8x256xbf16>, vector<8x256xbf16>, vector<8x256xbf16>, vector<8x256xbf16>, vector<8x256xbf16>, vector<8x256xbf16>, vector<8x256xbf16> -> vector<72x256xbf16>
    %c0_12 = arith.constant 0 : index
    %c0_13 = arith.constant 0 : index
    %60 = vector.load %arg2[%c0_12, %c0_13] : memref<8x72xbf16, #tpu.memory_space<vmem>>, vector<8x72xbf16>
    %cst_14 = arith.constant dense<0.000000e+00> : vector<8x256xf32>
    %61 = tpu.matmul %60, %59, %cst_14 {dimension_numbers = #tpu.dot_dimension_numbers<[1], [0], [0], [1], [0, 0, 1, 1], [], []>} : vector<8x72xbf16>, vector<72x256xbf16>, vector<8x256xf32> -> vector<8x256xf32>
    %c0_15 = arith.constant 0 : index
    %c0_16 = arith.constant 0 : index
    %62 = vector.load %arg4[%c0_15, %c0_16] : memref<8x1xf32, #tpu.memory_space<vmem>>, vector<8x1xf32>
    %63 = vector.broadcast %62 : vector<8x1xf32> to vector<8x256xf32>
    %64 = arith.addf %61, %63 : vector<8x256xf32>
    %65 = math.tanh %64 : vector<8x256xf32>
    %66 = arith.truncf %65 : vector<8x256xf32> to vector<8x256xbf16>
    %cst_17 = arith.constant 0.000000e+00 : bf16
    %67 = vector.broadcast %cst_17 : bf16 to vector<8x17xbf16>
    %68 = tpu.concatenate %67, %66, %67 in 1 : vector<8x17xbf16>, vector<8x256xbf16>, vector<8x17xbf16> -> vector<8x290xbf16>
    %69 = vector.extract_strided_slice %68 {offsets = [0, 0], sizes = [8, 256], strides = [1, 1]} : vector<8x290xbf16> to vector<8x256xbf16>
    %cst_18 = arith.constant 0.000000e+00 : bf16
    %70 = vector.broadcast %cst_18 : bf16 to vector<8x256xbf16>
    %71 = vector.shape_cast %18 : vector<1x256xi1> to vector<1x256xi1>
    %72 = vector.broadcast %71 : vector<1x256xi1> to vector<8x256xi1>
    %73 = arith.select %72, %69, %70 : vector<8x256xi1>, vector<8x256xbf16>
    %74 = vector.extract_strided_slice %68 {offsets = [0, 1], sizes = [8, 256], strides = [1, 1]} : vector<8x290xbf16> to vector<8x256xbf16>
    %75 = vector.extract_strided_slice %68 {offsets = [0, 2], sizes = [8, 256], strides = [1, 1]} : vector<8x290xbf16> to vector<8x256xbf16>
    %cst_19 = arith.constant 0.000000e+00 : bf16
    %76 = vector.broadcast %cst_19 : bf16 to vector<8x256xbf16>
    %77 = vector.shape_cast %20 : vector<1x256xi1> to vector<1x256xi1>
    %78 = vector.broadcast %77 : vector<1x256xi1> to vector<8x256xi1>
    %79 = arith.select %78, %75, %76 : vector<8x256xi1>, vector<8x256xbf16>
    %80 = vector.extract_strided_slice %68 {offsets = [0, 16], sizes = [8, 256], strides = [1, 1]} : vector<8x290xbf16> to vector<8x256xbf16>
    %cst_20 = arith.constant 0.000000e+00 : bf16
    %81 = vector.broadcast %cst_20 : bf16 to vector<8x256xbf16>
    %82 = vector.shape_cast %18 : vector<1x256xi1> to vector<1x256xi1>
    %83 = vector.broadcast %82 : vector<1x256xi1> to vector<8x256xi1>
    %84 = arith.select %83, %80, %81 : vector<8x256xi1>, vector<8x256xbf16>
    %85 = vector.extract_strided_slice %68 {offsets = [0, 17], sizes = [8, 256], strides = [1, 1]} : vector<8x290xbf16> to vector<8x256xbf16>
    %86 = vector.extract_strided_slice %68 {offsets = [0, 18], sizes = [8, 256], strides = [1, 1]} : vector<8x290xbf16> to vector<8x256xbf16>
    %cst_21 = arith.constant 0.000000e+00 : bf16
    %87 = vector.broadcast %cst_21 : bf16 to vector<8x256xbf16>
    %88 = vector.shape_cast %20 : vector<1x256xi1> to vector<1x256xi1>
    %89 = vector.broadcast %88 : vector<1x256xi1> to vector<8x256xi1>
    %90 = arith.select %89, %86, %87 : vector<8x256xi1>, vector<8x256xbf16>
    %91 = vector.extract_strided_slice %68 {offsets = [0, 32], sizes = [8, 256], strides = [1, 1]} : vector<8x290xbf16> to vector<8x256xbf16>
    %cst_22 = arith.constant 0.000000e+00 : bf16
    %92 = vector.broadcast %cst_22 : bf16 to vector<8x256xbf16>
    %93 = vector.shape_cast %18 : vector<1x256xi1> to vector<1x256xi1>
    %94 = vector.broadcast %93 : vector<1x256xi1> to vector<8x256xi1>
    %95 = arith.select %94, %91, %92 : vector<8x256xi1>, vector<8x256xbf16>
    %96 = vector.extract_strided_slice %68 {offsets = [0, 33], sizes = [8, 256], strides = [1, 1]} : vector<8x290xbf16> to vector<8x256xbf16>
    %97 = vector.extract_strided_slice %68 {offsets = [0, 34], sizes = [8, 256], strides = [1, 1]} : vector<8x290xbf16> to vector<8x256xbf16>
    %cst_23 = arith.constant 0.000000e+00 : bf16
    %98 = vector.broadcast %cst_23 : bf16 to vector<8x256xbf16>
    %99 = vector.shape_cast %20 : vector<1x256xi1> to vector<1x256xi1>
    %100 = vector.broadcast %99 : vector<1x256xi1> to vector<8x256xi1>
    %101 = arith.select %100, %97, %98 : vector<8x256xi1>, vector<8x256xbf16>
    %102 = tpu.concatenate %73, %74, %79, %84, %85, %90, %95, %96, %101 in 0 : vector<8x256xbf16>, vector<8x256xbf16>, vector<8x256xbf16>, vector<8x256xbf16>, vector<8x256xbf16>, vector<8x256xbf16>, vector<8x256xbf16>, vector<8x256xbf16>, vector<8x256xbf16> -> vector<72x256xbf16>
    %c0_24 = arith.constant 0 : index
    %c0_25 = arith.constant 0 : index
    %103 = vector.load %arg3[%c0_24, %c0_25] : memref<8x72xbf16, #tpu.memory_space<vmem>>, vector<8x72xbf16>
    %cst_26 = arith.constant dense<0.000000e+00> : vector<8x256xf32>
    %104 = tpu.matmul %103, %102, %cst_26 {dimension_numbers = #tpu.dot_dimension_numbers<[1], [0], [0], [1], [0, 0, 1, 1], [], []>} : vector<8x72xbf16>, vector<72x256xbf16>, vector<8x256xf32> -> vector<8x256xf32>
    %c0_27 = arith.constant 0 : index
    %c0_28 = arith.constant 0 : index
    %c0_29 = arith.constant 0 : index
    %105 = vector.load %arg1[%c0_27, %c0_28, %c0_29] : memref<1x8x256xf32, #tpu.memory_space<vmem>>, vector<1x8x256xf32>
    %106 = vector.shape_cast %105 : vector<1x8x256xf32> to vector<8x256xf32>
    %c0_30 = arith.constant 0 : index
    %c0_31 = arith.constant 0 : index
    %107 = vector.load %arg5[%c0_30, %c0_31] : memref<8x1xf32, #tpu.memory_space<vmem>>, vector<8x1xf32>
    %108 = vector.broadcast %107 : vector<8x1xf32> to vector<8x256xf32>
    %109 = arith.addf %104, %108 : vector<8x256xf32>
    %110 = arith.addf %109, %106 : vector<8x256xf32>
    %111 = math.tanh %110 : vector<8x256xf32>
    %c0_32 = arith.constant 0 : index
    %c0_33 = arith.constant 0 : index
    %c0_34 = arith.constant 0 : index
    %112 = vector.load %arg6[%c0_32, %c0_33, %c0_34] : memref<1x8x256xf32, #tpu.memory_space<vmem>>, vector<1x8x256xf32>
    %113 = vector.shape_cast %112 : vector<1x8x256xf32> to vector<8x256xf32>
    %114 = vector.shape_cast %111 : vector<8x256xf32> to vector<1x8x256xf32>
    tpu.vector_store %arg6[%c0_32, %c0_33, %c0_34], %114 {strides = array<i32>} : memref<1x8x256xf32, #tpu.memory_space<vmem>>, vector<1x8x256xf32>,
    return
  }
  func.func @transform_0(%arg0: i32) -> (i32, i32, i32) {
    %c0_i32 = arith.constant 0 : i32
    %c0_i32_0 = arith.constant 0 : i32
    %c0_i32_1 = arith.constant 0 : i32
    return %arg0, %c0_i32, %c0_i32_0 : i32, i32, i32
  }
  func.func @transform_1(%arg0: i32) -> (i32, i32) {
    %c0_i32 = arith.constant 0 : i32
    %c0_i32_0 = arith.constant 0 : i32
    %c0_i32_1 = arith.constant 0 : i32
    return %c0_i32, %c0_i32_0 : i32, i32
  }
  func.func @transform_2(%arg0: i32) -> (i32, i32) {
    %c0_i32 = arith.constant 0 : i32
    %c0_i32_0 = arith.constant 0 : i32
    %c0_i32_1 = arith.constant 0 : i32
    return %c0_i32, %c0_i32_0 : i32, i32
  }
  func.func @transform_3(%arg0: i32) -> (i32, i32) {
    %c0_i32 = arith.constant 0 : i32
    %c0_i32_0 = arith.constant 0 : i32
    %c0_i32_1 = arith.constant 0 : i32
    return %c0_i32, %c0_i32_0 : i32, i32
  }
  func.func @transform_4(%arg0: i32) -> (i32, i32) {
    %c0_i32 = arith.constant 0 : i32
    %c0_i32_0 = arith.constant 0 : i32
    %c0_i32_1 = arith.constant 0 : i32
    return %c0_i32, %c0_i32_0 : i32, i32
  }
  func.func @transform_5(%arg0: i32) -> (i32, i32, i32) {
    %c0_i32 = arith.constant 0 : i32
    %c0_i32_0 = arith.constant 0 : i32
    %c0_i32_1 = arith.constant 0 : i32
    return %arg0, %c0_i32, %c0_i32_0 : i32, i32, i32
  }
}

</mosaic_0001>

<bundles_post_ra>
// kernel: tpu_custom_call.1
= control target key start
LH: loop header
LB: loop body
LE: loop exit
PB: predicated region body
PF: predicated region fallthrough
CT: control target
= control target key end

     0   :  { %10 = vsyncpa [#allocation3], 0  ;;  %s1592_s0 = inlined_call_operand.hbm [shape: f32[2,8,256], index: 0, kind: input, shape index: {}]   ;;  %s1593_s1 = inlined_call_operand.vmem [shape: bf16[8,72], index: 1, kind: input, shape index: {}]   ;;  %s1594_s2 = inlined_call_operand.vmem [shape: bf16[8,72], index: 2, kind: input, shape index: {}]   ;;  %s1595_s3 = inlined_call_operand.vmem [shape: f32[8,1], index: 3, kind: input, shape index: {}]   ;;  %s1596_s4 = inlined_call_operand.vmem [shape: f32[8,1], index: 4, kind: input, shape index: {}]   ;;  %s1597_s5 = inlined_call_operand.hbm [shape: f32[2,8,256], index: 5, kind: output, shape index: {}]  }
   0x1   :  { %12 = vsyncpa [#allocation3 + $0x1], 0 }
   0x2   :  { %13 = vsyncpa [#allocation4], 0 }
   0x3   :  { %15 = vsyncpa [#allocation4 + $0x1], 0  ;;  %s1117_s18 = smov 0   ;;  %s1119_s19 = smov 0  }
   0x4   :  { %s1121_s20 = smov 0   ;;  %s1123_s21 = smov 0  }
   0x5 LB: > { %s1138_s22 = sadd.s32 4294967295, %s1068_s21   ;;  %s882_s23 = sadd.s32 4294967294, %s1068_s21   ;;  %s1068_s21 = sphi %s1123_s21, %s1640_s21   ;;  %s1064_s20 = sphi %s1121_s20, %s1639_s20   ;;  %s1060_s19 = sphi %s1119_s19, %s1638_s19   ;;  %s1056_s18 = sphi %s1117_s18, %s1637_s18  }
   0x6   : > { %s1142_s24 = sadd.s32 1, %s1068_s21   ;;  %s28_s25 = sadd.s32 1, %s1064_s20 }
   0x7   : > { %s25_s26 = ssub.s32 %s1068_s21, %s1142_s24  ;;  %p35_p0 = scmp.ne.s32.totalorder %s1064_s20, %s1060_s19 }
   0x8   : > { %p26_p1 = scmp.eq.s32.totalorder %s25_s26, 0  ;;  %p36_p2 = scmp.eq.s32.totalorder %s1068_s21, 0 }
   0x9   : > { %p41_p3 = scmp.ne.s32.totalorder %s1060_s19, %s1056_s18  ;;  %p42_p4 = scmp.eq.s32.totalorder %s1138_s22, 0 }
   0xa   : > { %s1154_s27 = scalar_select %p26_p1, %s1064_s20, %s28_s25  }
   0xb   : > { %p1156_p5 = por %p36_p2, %p35_p0  ;;  %p1160_p6 = por %p42_p4, %p41_p3 }
   0xc   : > { %p149_p7 = scmp.eq.s32.totalorder %s1138_s22, 1  ;;  %p155_p8 = scmp.eq.s32.totalorder %s882_s23, 1 }
   0xd   : > { %p914_p10 = scmp.lt.s32.totalorder %s1068_s21, 2  ;;  %s187_s7 = sand.u32 1, %s1064_s20  }
   0xe   : > { %p1167_p11 = por %p149_p7, %p35_p0  ;;  %p1171_p12 = por %p155_p8, %p41_p3 }
   0xf   : > { %s900_s8 = sshll.u32 %s1068_s21, 8  ;;  %s885_s9 = sshll.u32 %s187_s7, 4 }
  0x10   : > { %s1613_s30 = scalar_select %p1167_p11, 1, 0 }
  0x11   : > { %s1614_s6 = scalar_select %p1171_p12, 1, 0 }
  0x12   : > { %s1180_s12 = scalar_lea.hbm %s1592_s0, %s900_s8  ;;  %s191_s13 = scalar_lea.vmem [#allocation2], %s885_s9 }
  0x13   : > { %s199_s14 = sshll.u32 %s191_s13, 4  ;;  %p1184_p13 = pnand %p914_p10, %p1156_p5  ;;  %s1188_s14 = int_to_ptr.vmem [resolvable:$true] %s199_s14 }
  0x14   : > { %s188_s16 = scalar_lea.sflag [#allocation3], %s187_s7  ;;  %s972_s17 = scalar_lea.hbm %s1180_s12, 256 }
  0x15   : > { %p973_p2 = scmp.ne.s32.totalorder %s1180_s12, %s972_s17  ;;  %p974_p3 = pneg %p1184_p13 }
  0x16   : > { %s977_s26 = scalar_lea.hbm %s1592_s0, 512  ;;  %p978_p5 = scmp.lt.u32.totalorder %s1180_s12, %s1592_s0 }
  0x17   : > { %p975_p4 = pnand %p974_p3, %p973_p2  ;;  %p979_p8 = scmp.lt.u32.totalorder %s977_s26, %s972_s17 }
  0x18   : > { %p981_p9 = scmp.lt.u32.totalorder %s972_s17, %s1180_s12 }
  0x19   : > { %p976_p7 = pneg %p975_p4  ;;  %p980_p10 = por %p979_p8, %p978_p5 }
  0x1b   : > { %p982_p0 = por %p981_p9, %p980_p10 }
  0x1d   : > { %p983_p1 = pnand %p982_p0, %p976_p7 }
  0x1f   : > { %986 = shalt.err (!%p983_p1)
}
  0x20   : > { %s987_s7 = scalar_lea.vmem %s1188_s14, 256  ;;  %s1070_s9 = smov [#allocation2]  }
  0x21   : > { %p988_p2 = scmp.ne.s32.totalorder %s1188_s14, %s987_s7  ;;  %s992_s10 = sshll.u32 %s1070_s9, 4  ;;  %s993_s10 = int_to_ptr.vmem [resolvable:$false] %s992_s10 }
  0x22   : > { %s994_s11 = scalar_lea.vmem %s993_s10, 512  ;;  %p995_p11 = scmp.lt.s32.totalorder %s1188_s14, %s993_s10 }
  0x23   : > { %p990_p4 = pnand %p988_p2, %p974_p3  ;;  %p996_p5 = scmp.lt.s32.totalorder %s994_s11, %s987_s7 }
  0x25   : > { %p991_p12 = pneg %p990_p4  ;;  %p997_p8 = por %p996_p5, %p995_p11 }
  0x27   : > { %p998_p9 = pnand %p997_p8, %p991_p12 }
  0x29   : > { %1001 = shalt.err (!%p998_p9)
}
  0x2a   : > { %909 = dma.hbm_to_vmem [thread:$0]  (!%p1184_p13), %s1180_s12, 256, %s1188_s14, %s188_s16  }
  0x2b   : > { %p1616_p0 = scmp.lt.s32.totalorder %s1068_s21, 3  ;;  %p1617_p1 = scmp.ge.s32.totalorder %s1068_s21, 1 }
  0x2d   : > { %p205_p3 = pnand %p1617_p1, %p1616_p0 }
  0x2e   : > { %s1222_s13 = sand.u32 (!%p205_p3), 1, %s1060_s19  }
  0x2f   : > { %208 = sbr.rel (%p205_p3) target bundleno = 1098 (0x44a), region = 40  ;;  %s889_s17 = sshll.u32 (!%p205_p3), %s1222_s13, 4 }
  0x30   : > { %s211_s23 = scalar_lea.sflag (!%p205_p3), [#allocation3], %s1222_s13  ;;  %s214_s15 = scalar_lea.vmem (!%p205_p3), [#allocation2], %s889_s17 }
  0x36   : > { %1047 = dma.done.wait (%p1160_p6), %s211_s23, 256  }
  0x37   : > { %1049 = vsyncadd (%p1160_p6), %s211_s23, 4294967040  ;;  %v244_v0 = vlaneseq  ;;  %v1071_v1 = vmov 0   ;;  %v1232_v7 = vld [vmem:[%s214_s15] sm:$0xff]  ;;  %v1234_v9 = vld [vmem:[%s214_s15 + $0x8] sm:$0xff]  ;;  %s1072_s29 = smov 17   ;;  %s1073_s12 = smov 16  }
  0x38   : > { %568 = vmatprep.mubr.bf16.mxu0 %v1071_v1  ;;  %963 = vset.pattern.permute.xlu0 %v1071_v1  ;;  %v277_v10 = vpack.c.bf16 %v1232_v7, %v1232_v7  ;;  %v278_v13 = vpack.c.bf16 %v1234_v9, %v1234_v9  ;;  %s1074_s14 = smov 2   ;;  %s1075_s16 = smov 18   ;;  %vm285_vm6 = vcmask 138240   ;;  %vm332_vm7 = vcmask 15360   ;;  %v520_v63 = vld [vmem:[%s1595_s3] sm:$0xff] }
  0x39   : > { %v245_v2 = vand.u32 127, %v244_v0  ;;  %782 = vmatprep.mubr.bf16.mxu1 %v1071_v1  ;;  %v303_v3 = vshrl.u32 %v244_v0, 7  ;;  %s1076_s25 = smov 32   ;;  %s1077_s26 = smov 34   ;;  %vm344_vm10 = vcmask 130048   ;;  %vm368_vm11 = vcmask 261120  }
  0x3a   : > { %281 = vrot.lane.b32.xlu0 %v277_v10, %s1072_s29  ;;  %s1078_s28 = smov 111   ;;  %s1079_s8 = smov 127   ;;  %vm356_vm15 = vcmask 146432  }
  0x3b   : > { %v246_v4 = vadd.s32 128, %v245_v2  ;;  %v251_v5 = vand.u32 15, %v245_v2  ;;  %v304_v8 = vsub.s32 0, %v303_v3  ;;  %v308_v11 = vsub.s32 4, %v303_v3  ;;  %s1080_s7 = smov 95   ;;  %s1081_s9 = smov 126  }
  0x3c   : > { %s1082_s10 = smov 96   ;;  %s1083_s11 = smov 112  }
  0x3d   : > { %v258_v6 = vand.u32 15, %v246_v4  ;;  %vm271_vm0 = vcmp.ge.s32.totalorder %v251_v5, 1  ;;  %vm273_vm1 = vcmp.le.s32.totalorder %v251_v5, 14  ;;  %s1084_s23 = smov 110   ;;  %s1085_s15 = smov 94  }
  0x3e   : > { %283 = vrot.lane.b32.xlu0 %v278_v13, %s1072_s29  ;;  %p1634_p11 = scmp.ne.s32.totalorder %s1613_s30, 0 }
  0x3f   : > { %vm272_vm2 = vcmp.ge.s32.totalorder %v258_v6, 1  ;;  %vm274_vm3 = vcmp.le.s32.totalorder %v258_v6, 14 }
  0x40   : > { %vm300_vm4 = vmpackc.low %vm272_vm2, %vm271_vm0 }
  0x41   : > { %v301_v12 = vsel %vm300_vm4, 65537, %v1071_v1  ;;  %vm318_vm5 = vmpackc.low %vm274_vm3, %vm273_vm1 }
  0x42   : > { %v1241_v14 = vrot.slane %v301_v12, %v304_v8  ;;  %v319_v15 = vsel %vm318_vm5, 65537, %v1071_v1  ;;  %v1244_v16 = vrot.slane %v301_v12, %v308_v11 }
  0x43   : > { %v323_v17 = vrot.slane %v319_v15, %v304_v8  ;;  %v327_v18 = vrot.slane %v319_v15, %v308_v11 }
  0x44   : > { %340 = vrot.lane.b32.xlu1 %v1241_v14, %s1073_s12 }
  0x45   : > { %328 = vrot.lane.b32.xlu0 %v323_v17, %s1074_s14 }
  0x48   : > { %342 = vrot.lane.b32.xlu1 %v1244_v16, %s1073_s12  ;;  %s798_s12 = scalar_lea.sflag [#allocation4], %s1222_s13 }
  0x49   : > { %352 = vrot.lane.b32.xlu0 %v323_v17, %s1075_s16 }
  0x4c   : > { %330 = vrot.lane.b32.xlu1 %v327_v18, %s1074_s14 }
  0x4d   : > { %364 = vrot.lane.b32.xlu0 %v1241_v14, %s1076_s25 }
  0x50   : > { %354 = vrot.lane.b32.xlu1 %v327_v18, %s1075_s16 }
  0x51   : > { %376 = vrot.lane.b32.xlu0 %v323_v17, %s1077_s26 }
  0x54   : > { %366 = vrot.lane.b32.xlu1 %v1244_v16, %s1076_s25 }
  0x58   : > { %378 = vrot.lane.b32.xlu1 %v327_v18, %s1077_s26 }
  0xac   : > { %v282_v19 = vpop.permute.xlu0 %281 }
  0xad   : > { %v1266_v26 = vsel %vm285_vm6, 0, %v282_v19 }
  0xae   : > { %v390_v30 = vrot.slane %v1266_v26, 4 }
  0xb0   : > { %v284_v21 = vpop.permute.xlu0 %283 }
  0xb1   : > { %v1253_v22 = vsel %vm285_vm6, %v282_v19, %v284_v21  ;;  %v1256_v23 = vsel %vm285_vm6, %v284_v21, 0 }
  0xb2   : > { %433 = vrot.lane.b32.xlu0 %v1256_v23, %s1078_s28  ;;  %431 = vrot.lane.b32.xlu1 %v1253_v22, %s1078_s28  ;;  %v391_v25 = vrot.slane %v1253_v22, 4  ;;  %v392_v29 = vrot.slane %v1256_v23, 4 }
  0xb6   : > { %v1250_v20 = vpop.permute.xlu1 %340  ;;  %429 = vrot.lane.b32.xlu1 %v1266_v26, %s1078_s28  ;;  %395 = vrot.lane.b32.xlu0 %v391_v25, %s1079_s8 }
  0xb7   : > { %v1268_v27 = vpop.permute.xlu0 %328  ;;  %vm346_vm0 = vcmp.ne.s16.totalorder %v1250_v20, 0 }
  0xb8   : > { %vm334_vm8 = vcmp.ne.s16.totalorder %v1268_v27, 0  ;;  %v349_v45 = vsel %vm346_vm0, %v1266_v26, 0 }
  0xb9   : > { %v337_v36 = vsel %vm334_vm8, %v1266_v26, 0  ;;  %v417_v48 = vrot.slane %v349_v45, 4 }
  0xba   : > { %v1262_v24 = vpop.permute.xlu1 %342  ;;  %397 = vrot.lane.b32.xlu1 %v392_v29, %s1079_s8  ;;  %393 = vrot.lane.b32.xlu0 %v390_v30, %s1079_s8 }
  0xbb   : > { %v1283_v32 = vpop.permute.xlu0 %352  ;;  %vm348_vm12 = vcmp.ne.s16.totalorder %v1262_v24, 0  ;;  %v1310_v38 = vsel %vm344_vm10, %v1250_v20, %v1262_v24  ;;  %vm380_vm10 = vcmask 277504  }
  0xbc   : > { %v351_v40 = vsel %vm348_vm12, %v1256_v23, 0  ;;  %vm347_vm1 = vcmp.ne.s16.totalorder %v1310_v38, 0  ;;  %vm358_vm5 = vcmp.ne.s16.totalorder %v1283_v32, 0 }
  0xbd   : > { %v419_v44 = vrot.slane %v351_v40, 4  ;;  %v350_v46 = vsel %vm347_vm1, %v1253_v22, 0  ;;  %v361_v54 = vsel %vm358_vm5, %v1266_v26, 0 }
  0xbe   : > { %v1273_v28 = vpop.permute.xlu1 %330  ;;  %467 = vrot.lane.b32.xlu1 %v391_v25, %s1080_s7  ;;  %469 = vrot.lane.b32.xlu0 %v392_v29, %s1080_s7  ;;  %v418_v49 = vrot.slane %v350_v46, 4  ;;  %v441_v56 = vrot.slane %v361_v54, 4 }
  0xbf   : > { %vm336_vm9 = vcmp.ne.s16.totalorder %v1273_v28, 0  ;;  %v1291_v33 = vsel %vm332_vm7, %v1268_v27, %v1273_v28  ;;  %v1303_v37 = vpop.permute.xlu0 %364 }
  0xc0   : > { %v339_v35 = vsel %vm336_vm9, %v1256_v23, 0  ;;  %vm335_vm13 = vcmp.ne.s16.totalorder %v1291_v33, 0  ;;  %vm1602_vm7 = vcmp.ne.s16.totalorder %v1303_v37, 0 }
  0xc1   : > { %v338_v42 = vsel %vm335_vm13, %v1253_v22, 0  ;;  %v373_v58 = vsel %vm1602_vm7, %v1266_v26, 0  ;;  %vm486_vm7 = vcmask 1043456  }
  0xc2   : > { %v1281_v31 = vpop.permute.xlu1 %354  ;;  %409 = vrot.lane.b32.xlu0 %v339_v35, %s1081_s9  ;;  %405 = vrot.lane.b32.xlu1 %v337_v36, %s1081_s9 }
  0xc3   : > { %v1332_v43 = vsel %vm356_vm15, %v1283_v32, %v1281_v31  ;;  %vm1599_vm4 = vcmp.ne.s16.totalorder %v1281_v31, 0  ;;  %v1362_v55 = vpop.permute.xlu0 %376 }
  0xc4   : > { %vm1607_vm3 = vcmp.ne.s16.totalorder %v1332_v43, 0  ;;  %v363_v51 = vsel %vm1599_vm4, %v1256_v23, 0 }
  0xc5   : > { %v362_v50 = vsel %vm1607_vm3, %v1253_v22, 0  ;;  %v443_v53 = vrot.slane %v363_v51, 4  ;;  %vm462_vm3 = vcmask 785408  }
  0xc6   : > { %v1293_v34 = vpop.permute.xlu1 %366  ;;  %407 = vrot.lane.b32.xlu1 %v338_v42, %s1081_s9  ;;  %v442_v52 = vrot.slane %v362_v50, 4 }
  0xc7   : > { %vm372_vm14 = vcmp.ne.s16.totalorder %v1293_v34, 0  ;;  %v1314_v39 = vsel %vm368_vm11, %v1303_v37, %v1293_v34  ;;  %vm1601_vm11 = vcmp.ne.s16.totalorder %v1362_v55, 0 }
  0xc8   : > { %v375_v41 = vsel %vm372_vm14, %v1256_v23, 0  ;;  %vm371_vm2 = vcmp.ne.s16.totalorder %v1314_v39, 0  ;;  %v385_v60 = vsel %vm1601_vm11, %v1266_v26, 0  ;;  %vm1605_vm11 = vcmp.ne.s16.totalorder %v1241_v14, 0 }
  0xc9   : > { %460 = vrot.lane.b32.xlu0 %v375_v41, %s1082_s10  ;;  %v374_v47 = vsel %vm371_vm2, %v1253_v22, 0  ;;  %v312_v11 = vsel %vm1605_vm11, %v1266_v26, 0  ;;  %vm435_vm11 = vcmask 908288  }
  0xca   : > { %458 = vrot.lane.b32.xlu1 %v374_v47, %s1082_s10  ;;  %v1364_v57 = vpop.permute.xlu1 %378 }
  0xcb   : > { %v1374_v59 = vsel %vm380_vm10, %v1362_v55, %v1364_v57  ;;  %vm1600_vm4 = vcmp.ne.s16.totalorder %v1364_v57, 0  ;;  %vm1603_vm10 = vcmask 1039360  }
  0xcc   : > { %vm1606_vm15 = vcmp.ne.s16.totalorder %v1374_v59, 0  ;;  %v387_v61 = vsel %vm1600_vm4, %v1256_v23, 0  ;;  %vm1604_vm4 = vcmp.ne.s16.totalorder %v1244_v16, 0 }
  0xcd   : > { %424 = vrot.lane.b32.xlu0 %v419_v44, %s1083_s11  ;;  %v386_v62 = vsel %vm1606_vm15, %v1253_v22, 0  ;;  %v313_v10 = vsel %vm1604_vm4, %v1253_v22, 0  ;;  %vm1609_vm4 = vcmask 916480   ;;  %vm450_vm15 = vcmask 900096  }
  0xce   : > { %422 = vrot.lane.b32.xlu1 %v418_v49, %s1083_s11 }
  0xd1   : > { %420 = vrot.lane.b32.xlu0 %v417_v48, %s1083_s11 }
  0xd2   : > { %446 = vrot.lane.b32.xlu1 %v442_v52, %s1084_s23 }
  0xd5   : > { %448 = vrot.lane.b32.xlu0 %v443_v53, %s1084_s23 }
  0xd6   : > { %456 = vrot.lane.b32.xlu1 %v373_v58, %s1082_s10 }
  0xd9   : > { %444 = vrot.lane.b32.xlu0 %v441_v56, %s1084_s23 }
  0xda   : > { %477 = vrot.lane.b32.xlu1 %v385_v60, %s1085_s15 }
  0xdd   : > { %465 = vrot.lane.b32.xlu0 %v390_v30, %s1080_s7 }
  0xde   : > { %481 = vrot.lane.b32.xlu1 %v387_v61, %s1085_s15 }
  0xe1   : > { %479 = vrot.lane.b32.xlu0 %v386_v62, %s1085_s15 }
  0xe5   : > { %523 = vperm.xlu0 %963, %v520_v63  }
 0x124   : > { %v432_v0 = vpop.permute.xlu1 %431  ;;  %v434_v1 = vpop.permute.xlu0 %433 }
 0x125   : > { %v437_v46 = vsel %vm435_vm11, %v432_v0, %v434_v1 }
 0x128   : > { %v430_v2 = vpop.permute.xlu1 %429  ;;  %v396_v3 = vpop.permute.xlu0 %395 }
 0x129   : > { %v436_v52 = vsel %vm435_vm11, %v430_v2, %v432_v0 }
 0x12c   : > { %v398_v4 = vpop.permute.xlu1 %397  ;;  %v394_v5 = vpop.permute.xlu0 %393 }
 0x12d   : > { %v401_v6 = vsel %vm1603_vm10, %v396_v3, %v398_v4  ;;  %v400_v8 = vsel %vm1603_vm10, %v394_v5, %v396_v3  ;;  %vm1608_vm10 = vcmask 1031168  }
 0x12e   : > { %v493_v12 = vsel %vm486_vm7, %v313_v10, %v401_v6  ;;  %v489_v13 = vsel %vm486_vm7, %v312_v11, %v400_v8  ;;  %v519_v6 = vld [vmem:[%s1593_s1] sm:$0xf] }
 0x12f   : > { %536 = vmatprep.subr.bf16.mxu0 %v493_v12 }
 0x130   : > { %v468_v15 = vpop.permute.xlu1 %467  ;;  %537 = vmatpush1.bf16.msra.mxu0 %v489_v13  ;;  %v470_v17 = vpop.permute.xlu0 %469 }
 0x134   : > { %v406_v18 = vpop.permute.xlu1 %405  ;;  %v410_v19 = vpop.permute.xlu0 %409 }
 0x138   : > { %v408_v21 = vpop.permute.xlu1 %407 }
 0x139   : > { %v412_v26 = vsel %vm1608_vm10, %v406_v18, %v408_v21  ;;  %v413_v35 = vsel %vm1608_vm10, %v408_v21, %v410_v19  ;;  %vm1610_vm10 = vcmask 777216  }
 0x13a   : > { %v473_v54 = vsel %vm1610_vm10, %v468_v15, %v470_v17 }
 0x13b   : > { %v461_v23 = vpop.permute.xlu0 %460 }
 0x13c   : > { %v459_v25 = vpop.permute.xlu1 %458 }
 0x13d   : > { %v464_v49 = vsel %vm462_vm3, %v459_v25, %v461_v23 }
 0x13e   : > { %v517_v58 = vsel %vm486_vm7, %v464_v49, %v473_v54 }
 0x13f   : > { %v425_v29 = vpop.permute.xlu0 %424 }
 0x140   : > { %v423_v22 = vpop.permute.xlu1 %422 }
 0x141   : > { %v428_v36 = vsel %vm1609_vm4, %v423_v22, %v425_v29 }
 0x142   : > { %v501_v41 = vsel %vm486_vm7, %v413_v35, %v428_v36 }
 0x143   : > { %v421_v30 = vpop.permute.xlu0 %420  ;;  %538 = vmatprep.subr.bf16.mxu0 %v501_v41 }
 0x144   : > { %v427_v40 = vsel %vm1609_vm4, %v421_v30, %v423_v22  ;;  %v447_v44 = vpop.permute.xlu1 %446  ;;  %vm483_vm4 = vcmask 769024  }
 0x145   : > { %v497_v42 = vsel %vm486_vm7, %v412_v26, %v427_v40 }
 0x146   : > { %539 = vmatpush1.bf16.msra.mxu0 %v497_v42 }
 0x147   : > { %v449_v45 = vpop.permute.xlu0 %448 }
 0x148   : > { %v452_v47 = vsel %vm450_vm15, %v447_v44, %v449_v45  ;;  %v457_v50 = vpop.permute.xlu1 %456 }
 0x149   : > { %v509_v48 = vsel %vm486_vm7, %v437_v46, %v452_v47  ;;  %v463_v62 = vsel %vm462_vm3, %v457_v50, %v459_v25 }
 0x14a   : > { %540 = vmatprep.subr.bf16.mxu0 %v509_v48 }
 0x14b   : > { %v445_v51 = vpop.permute.xlu0 %444 }
 0x14c   : > { %v451_v53 = vsel %vm450_vm15, %v445_v51, %v447_v44  ;;  %v478_v60 = vpop.permute.xlu1 %477 }
 0x14d   : > { %v505_v56 = vsel %vm486_vm7, %v436_v52, %v451_v53 }
 0x14e   : > { %541 = vmatpush1.bf16.msra.mxu0 %v505_v56 }
 0x14f   : > { %542 = vmatprep.subr.bf16.mxu0 %v517_v58  ;;  %v466_v61 = vpop.permute.xlu0 %465 }
 0x150   : > { %v472_v63 = vsel %vm1610_vm10, %v466_v61, %v468_v15  ;;  %v482_v0 = vpop.permute.xlu1 %481  ;;  %vm526_vm10 = vcmask 588800  }
 0x151   : > { %v513_v1 = vsel %vm486_vm7, %v463_v62, %v472_v63 }
 0x152   : > { %543 = vmatpush1.bf16.msra.mxu0 %v513_v1 }
 0x153   : > { %v480_v2 = vpop.permute.xlu0 %479 }
 0x154   : > { %v484_v3 = vsel %vm483_vm4, %v478_v60, %v480_v2  ;;  %v485_v4 = vsel %vm483_vm4, %v480_v2, %v482_v0 }
 0x155   : > { %891 = vmatprep.subr.msk.bf16.mxu0 %vm486_vm7, %v485_v4  ;;  %v531_v5 = vsel %vm486_vm7, %v484_v3, 0 }
 0x156   : > { %545 = vmatpush1.bf16.msra.mxu0 %v531_v5 }
 0x159   : > { %892 = vmatmul.mubr.msk.bf16.vlgmr.msra.gmra.mrb[0].mxu0 %vm526_vm10, %v519_v6 }
 0x164   : > { %v524_v8 = vpop.permute.xlu0 %523 }
 0x22c   : > { %v570_v10 = vpop.f32.mrb[0].mxu0 }
 0x22d   : > { %v571_v11 = vadd.f32 %v570_v10, %v524_v8  ;;  %v572_v12 = vpop.f32.mrb[1].mxu0 }
 0x22e   : > { %v573_v13 = vadd.f32 %v572_v12, %v524_v8  ;;  %v574_v15 = vpop.f32.mrb[2].mxu0 }
 0x22f   : > { %964 = vtanh.f32 %v571_v11  ;;  %v575_v17 = vpop.f32.mrb[3].mxu0 }
 0x230   : > { %966 = vtanh.f32 %v573_v13 }
 0x239   : > { %v965_v18 = vpop.eup %964 }
 0x23a   : > { %v579_v19 = vpack.c.bf16 %v965_v18, %v965_v18  ;;  %v967_v21 = vpop.eup %966 }
 0x23b   : > { %v580_v23 = vpack.c.bf16 %v967_v21, %v967_v21 }
 0x23c   : > { %583 = vrot.lane.b32.xlu1 %v579_v19, %s1072_s29 }
 0x240   : > { %585 = vrot.lane.b32.xlu1 %v580_v23, %s1072_s29 }
 0x2ae   : > { %v584_v25 = vpop.permute.xlu1 %583 }
 0x2af   : > { %v1437_v29 = vsel %vm285_vm6, 0, %v584_v25 }
 0x2b0   : > { %650 = vrot.lane.b32.xlu1 %v1437_v29, %s1078_s28  ;;  %v597_v26 = vsel %vm334_vm8, %v1437_v29, 0  ;;  %v614_v35 = vrot.slane %v1437_v29, 4  ;;  %v600_v33 = vsel %vm346_vm0, %v1437_v29, 0  ;;  %v603_v34 = vsel %vm358_vm5, %v1437_v29, 0 }
 0x2b1   : > { %v639_v45 = vrot.slane %v600_v33, 4  ;;  %v661_v46 = vrot.slane %v603_v34, 4  ;;  %vm1619_vm8 = vcmp.ne.s16.totalorder %v1281_v31, 0  ;;  %vm1624_vm0 = vcmask 1039360  }
 0x2b2   : > { %v586_v22 = vpop.permute.xlu1 %585  ;;  %vm1627_vm5 = vcmp.ne.s16.totalorder %v1241_v14, 0 }
 0x2b3   : > { %v593_v30 = vsel %vm285_vm6, %v586_v22, 0  ;;  %v587_v36 = vsel %vm285_vm6, %v584_v25, %v586_v22  ;;  %vm1618_vm6 = vcmp.ne.s16.totalorder %v1332_v43, 0  ;;  %v595_v2 = vsel %vm1627_vm5, %v1437_v29, 0 }
 0x2b4   : > { %628 = vrot.lane.b32.xlu1 %v597_v26, %s1081_s9  ;;  %654 = vrot.lane.b32.xlu0 %v593_v30, %s1078_s28  ;;  %v599_v40 = vsel %vm336_vm9, %v593_v30, 0  ;;  %v598_v41 = vsel %vm335_vm13, %v587_v36, 0  ;;  %v608_v27 = vsel %vm372_vm14, %v593_v30, 0  ;;  %v607_v42 = vsel %vm371_vm2, %v587_v36, 0 }
 0x2b5   : > { %v615_v44 = vrot.slane %v587_v36, 4  ;;  %v616_v28 = vrot.slane %v593_v30, 4  ;;  %v601_v39 = vsel %vm347_vm1, %v587_v36, 0  ;;  %v602_v20 = vsel %vm348_vm12, %v593_v30, 0  ;;  %vm1625_vm1 = vmmov %vm1624_vm0 }
 0x2b6   : > { %v640_v47 = vrot.slane %v601_v39, 4  ;;  %v604_v48 = vsel %vm1618_vm6, %v587_v36, 0  ;;  %v641_v32 = vrot.slane %v602_v20, 4  ;;  %v605_v38 = vsel %vm1619_vm8, %v593_v30, 0  ;;  %v734_v20 = vld [vmem:[%s1594_s2] sm:$0xf] }
 0x2b7   : > { %v662_v49 = vrot.slane %v604_v48, 4  ;;  %v663_v50 = vrot.slane %v605_v38, 4  ;;  %vm1620_vm9 = vcmp.ne.s16.totalorder %v1303_v37, 0  ;;  %vm1621_vm12 = vcmp.ne.s16.totalorder %v1362_v55, 0  ;;  %v735_v55 = vld [vmem:[%s1596_s4] sm:$0xff] }
 0x2b8   : > { %617 = vrot.lane.b32.xlu0 %v614_v35, %s1079_s8  ;;  %652 = vrot.lane.b32.xlu1 %v587_v36, %s1078_s28  ;;  %v606_v24 = vsel %vm1620_vm9, %v1437_v29, 0  ;;  %v609_v43 = vsel %vm1621_vm12, %v1437_v29, 0  ;;  %vm1622_vm13 = vcmp.ne.s16.totalorder %v1364_v57, 0  ;;  %vm1623_vm14 = vcmp.ne.s16.totalorder %v1374_v59, 0 }
 0x2b9   : > { %v611_v31 = vsel %vm1622_vm13, %v593_v30, 0  ;;  %v610_v37 = vsel %vm1623_vm14, %v587_v36, 0  ;;  %vm1626_vm2 = vcmp.ne.s16.totalorder %v1244_v16, 0  ;;  %vm1628_vm6 = vcmask 916480  }
 0x2ba   : > { %v596_v0 = vsel %vm1626_vm2, %v587_v36, 0  ;;  %vm1629_vm8 = vcmask 1031168   ;;  %vm1630_vm9 = vmmov %vm1628_vm6  ;;  %vm1632_vm13 = vcmask 777216  }
 0x2bb   : > { %vm1631_vm12 = vmmov %vm1629_vm8 }
 0x2bc   : > { %632 = vrot.lane.b32.xlu0 %v599_v40, %s1081_s9  ;;  %630 = vrot.lane.b32.xlu1 %v598_v41, %s1081_s9  ;;  %s240_s9 = scalar_lea.vmem [#allocation5], %s889_s17 }
 0x2c0   : > { %679 = vrot.lane.b32.xlu0 %v608_v27, %s1082_s10  ;;  %677 = vrot.lane.b32.xlu1 %v607_v42, %s1082_s10 }
 0x2c4   : > { %619 = vrot.lane.b32.xlu0 %v615_v44, %s1079_s8  ;;  %621 = vrot.lane.b32.xlu1 %v616_v28, %s1079_s8 }
 0x2c8   : > { %642 = vrot.lane.b32.xlu0 %v639_v45, %s1083_s11  ;;  %685 = vrot.lane.b32.xlu1 %v615_v44, %s1080_s7 }
 0x2cc   : > { %664 = vrot.lane.b32.xlu0 %v661_v46, %s1084_s23  ;;  %644 = vrot.lane.b32.xlu1 %v640_v47, %s1083_s11 }
 0x2d0   : > { %646 = vrot.lane.b32.xlu0 %v641_v32, %s1083_s11  ;;  %666 = vrot.lane.b32.xlu1 %v662_v49, %s1084_s23 }
 0x2d4   : > { %668 = vrot.lane.b32.xlu0 %v663_v50, %s1084_s23  ;;  %675 = vrot.lane.b32.xlu1 %v606_v24, %s1082_s10  ;;  %s812_s10 = sshll.u32 %s240_s9, 4  ;;  %s1550_s10 = int_to_ptr.vmem [resolvable:$true] %s812_s10 }
 0x2d5   : > { %s1002_s14 = scalar_lea.vmem %s1550_s10, 256 }
 0x2d6   : > { %p1003_p6 = scmp.ne.s32.totalorder %s1550_s10, %s1002_s14 }
 0x2d8   : > { %687 = vrot.lane.b32.xlu0 %v616_v28, %s1080_s7  ;;  %694 = vrot.lane.b32.xlu1 %v609_v43, %s1085_s15  ;;  %p1004_p12 = pnand %p1003_p6, %p1634_p11 }
 0x2da   : > { %p1005_p13 = pneg %p1004_p12 }
 0x2dc   : > { %683 = vrot.lane.b32.xlu0 %v614_v35, %s1080_s7  ;;  %698 = vrot.lane.b32.xlu1 %v611_v31, %s1085_s15  ;;  %s901_s7 = sshll.u32 %s1138_s22, 8  ;;  %s1086_s22 = smov [#allocation5]  }
 0x2dd   : > { %s1006_s17 = sshll.u32 %s1086_s22, 4  ;;  %s1007_s17 = int_to_ptr.vmem [resolvable:$false] %s1006_s17 }
 0x2de   : > { %s1008_s16 = scalar_lea.vmem %s1007_s17, 512  ;;  %p1009_p7 = scmp.lt.s32.totalorder %s1550_s10, %s1007_s17 }
 0x2df   : > { %p1010_p10 = scmp.lt.s32.totalorder %s1008_s16, %s1002_s14 }
 0x2e0   : > { %696 = vrot.lane.b32.xlu0 %v610_v37, %s1085_s15  ;;  %s1548_s15 = scalar_lea.hbm %s1597_s5, %s901_s7 }
 0x2e1   : > { %p1011_p2 = por %p1010_p10, %p1009_p7 }
 0x2e3   : > { %p1012_p4 = pnand %p1011_p2, %p1005_p13 }
 0x2e4   : > { %738 = vperm.xlu0 %963, %v735_v55  }
 0x322   : > { %v651_v51 = vpop.permute.xlu1 %650 }
 0x326   : > { %v655_v52 = vpop.permute.xlu0 %654  ;;  %v629_v53 = vpop.permute.xlu1 %628 }
 0x32a   : > { %v618_v54 = vpop.permute.xlu0 %617  ;;  %v653_v57 = vpop.permute.xlu1 %652 }
 0x32b   : > { %v657_v25 = vsel %vm435_vm11, %v653_v57, %v655_v52  ;;  %v656_v22 = vsel %vm435_vm11, %v651_v51, %v653_v57 }
 0x32e   : > { %v633_v56 = vpop.permute.xlu0 %632  ;;  %v631_v58 = vpop.permute.xlu1 %630 }
 0x32f   : > { %v635_v16 = vsel %vm1629_vm8, %v631_v58, %v633_v56  ;;  %v634_v14 = vsel %vm1631_vm12, %v629_v53, %v631_v58 }
 0x332   : > { %v680_v60 = vpop.permute.xlu0 %679  ;;  %v678_v61 = vpop.permute.xlu1 %677 }
 0x333   : > { %v682_v36 = vsel %vm462_vm3, %v678_v61, %v680_v60 }
 0x336   : > { %v620_v62 = vpop.permute.xlu0 %619  ;;  %v622_v63 = vpop.permute.xlu1 %621 }
 0x337   : > { %v623_v59 = vsel %vm1624_vm0, %v618_v54, %v620_v62  ;;  %v624_v1 = vsel %vm1625_vm1, %v620_v62, %v622_v63 }
 0x338   : > { %v708_v3 = vsel %vm486_vm7, %v596_v0, %v624_v1  ;;  %v704_v4 = vsel %vm486_vm7, %v595_v2, %v623_v59 }
 0x339   : > { %750 = vmatprep.subr.bf16.mxu1 %v708_v3 }
 0x33a   : > { %v643_v5 = vpop.permute.xlu0 %642  ;;  %751 = vmatpush1.bf16.msra.mxu1 %v704_v4  ;;  %v686_v6 = vpop.permute.xlu1 %685 }
 0x33e   : > { %v665_v8 = vpop.permute.xlu0 %664  ;;  %v645_v10 = vpop.permute.xlu1 %644 }
 0x33f   : > { %v648_v11 = vsel %vm1628_vm6, %v643_v5, %v645_v10 }
 0x340   : > { %v712_v18 = vsel %vm486_vm7, %v634_v14, %v648_v11 }
 0x342   : > { %v647_v12 = vpop.permute.xlu0 %646  ;;  %v667_v13 = vpop.permute.xlu1 %666 }
 0x343   : > { %v649_v15 = vsel %vm1630_vm9, %v645_v10, %v647_v12  ;;  %v670_v19 = vsel %vm450_vm15, %v665_v8, %v667_v13 }
 0x344   : > { %v716_v17 = vsel %vm486_vm7, %v635_v16, %v649_v15  ;;  %v720_v26 = vsel %vm486_vm7, %v656_v22, %v670_v19 }
 0x345   : > { %752 = vmatprep.subr.bf16.mxu1 %v716_v17 }
 0x346   : > { %v669_v21 = vpop.permute.xlu0 %668  ;;  %753 = vmatpush1.bf16.msra.mxu1 %v712_v18  ;;  %v676_v23 = vpop.permute.xlu1 %675 }
 0x347   : > { %v671_v29 = vsel %vm450_vm15, %v667_v13, %v669_v21  ;;  %v681_v44 = vsel %vm462_vm3, %v676_v23, %v678_v61  ;;  %vm1633_vm15 = vmmov %vm1632_vm13 }
 0x348   : > { %v724_v30 = vsel %vm486_vm7, %v657_v25, %v671_v29 }
 0x349   : > { %754 = vmatprep.subr.bf16.mxu1 %v724_v30 }
 0x34a   : > { %v688_v35 = vpop.permute.xlu0 %687  ;;  %755 = vmatpush1.bf16.msra.mxu1 %v720_v26  ;;  %v695_v41 = vpop.permute.xlu1 %694 }
 0x34b   : > { %v690_v40 = vsel %vm1632_vm13, %v686_v6, %v688_v35 }
 0x34c   : > { %v732_v27 = vsel %vm486_vm7, %v682_v36, %v690_v40 }
 0x34d   : > { %756 = vmatprep.subr.bf16.mxu1 %v732_v27 }
 0x34e   : > { %v684_v42 = vpop.permute.xlu0 %683  ;;  %v699_v45 = vpop.permute.xlu1 %698 }
 0x34f   : > { %v689_v28 = vsel %vm1633_vm15, %v684_v42, %v686_v6 }
 0x350   : > { %v728_v33 = vsel %vm486_vm7, %v681_v44, %v689_v28 }
 0x351   : > { %757 = vmatpush1.bf16.msra.mxu1 %v728_v33 }
 0x352   : > { %v697_v34 = vpop.permute.xlu0 %696 }
 0x353   : > { %v700_v39 = vsel %vm483_vm4, %v695_v41, %v697_v34  ;;  %v701_v46 = vsel %vm483_vm4, %v697_v34, %v699_v45 }
 0x354   : > { %893 = vmatprep.subr.msk.bf16.mxu1 %vm486_vm7, %v701_v46  ;;  %v745_v47 = vsel %vm486_vm7, %v700_v39, 0 }
 0x355   : > { %759 = vmatpush1.bf16.msra.mxu1 %v745_v47 }
 0x358   : > { %894 = vmatmul.mubr.msk.bf16.vlgmr.msra.gmra.mrb[0].mxu1 %vm526_vm10, %v734_v20 }
 0x363   : > { %v739_v48 = vpop.permute.xlu0 %738 }
 0x42b   : > { %v784_v32 = vpop.f32.mrb[0].mxu1 }
 0x42c   : > { %v785_v49 = vadd.f32 %v784_v32, %v739_v48  ;;  %v786_v38 = vpop.f32.mrb[1].mxu1 }
 0x42d   : > { %v787_v50 = vadd.f32 %v786_v38, %v739_v48  ;;  %v788_v24 = vpop.f32.mrb[2].mxu1 }
 0x42e   : > { %v791_v43 = vadd.f32 %v785_v49, %v1232_v7  ;;  %v789_v31 = vpop.f32.mrb[3].mxu1 }
 0x42f   : > { %v792_v37 = vadd.f32 %v787_v50, %v1234_v9 }
 0x430   : > { %968 = vtanh.f32 %v791_v43 }
 0x431   : > { %970 = vtanh.f32 %v792_v37 }
 0x43a   : > { %v969_v55 = vpop.eup %968 }
 0x43b   : > { %v971_v7 = vpop.eup %970  ;;  %795 = vst [vmem:[%s240_s9] sm:$0xff] %v969_v55 }
 0x43c   : > { %796 = vst [vmem:[%s240_s9 + $0x8] sm:$0xff] %v971_v7 }
 0x43d   : > { %1015 = shalt.err (!%p1012_p4)
}
 0x43e   : > { %s1016_s13 = scalar_lea.hbm %s1548_s15, 256  ;;  %s1020_s26 = scalar_lea.hbm %s1597_s5, 512 }
 0x43f   : > { %p1017_p5 = scmp.ne.s32.totalorder %s1548_s15, %s1016_s13  ;;  %p1021_p0 = scmp.lt.u32.totalorder %s1548_s15, %s1597_s5 }
 0x440   : > { %p1022_p1 = scmp.lt.u32.totalorder %s1020_s26, %s1016_s13  ;;  %p1024_p6 = scmp.lt.u32.totalorder %s1016_s13, %s1548_s15 }
 0x441   : > { %p1018_p8 = pnand %p1017_p5, %p1634_p11 }
 0x442   : > { %p1023_p3 = por %p1022_p1, %p1021_p0 }
 0x443   : > { %p1019_p9 = pneg %p1018_p8 }
 0x444   : > { %p1025_p12 = por %p1024_p6, %p1023_p3 }
 0x446   : > { %p1026_p13 = pnand %p1025_p12, %p1019_p9 }
 0x448   : > { %1029 = shalt.err (!%p1026_p13)
}
 0x449   : > { %904 = dma.vmem_to_hbm [thread:$0]  (%p1634_p11), %s1550_s10, 256, %s1548_s15, %s798_s12  }
 0x44a PF: > { %s824_s7 = sand.u32 1, %s1056_s18   ;;  %p1635_p7 = scmp.ne.s32.totalorder %s1614_s6, 0 }
 0x44b   : > { %p1636_p10 = scmp.ge.s32.totalorder %s1068_s21, 2  ;;  %s825_s9 = scalar_lea.sflag [#allocation4], %s824_s7 }
 0x44d   : > { %p911_p2 = pnand %p1636_p10, %p1635_p7 }
 0x44f   : > { %1051 = dma.done.wait (!%p911_p2), %s825_s9, 256  }
 0x450   : > { %1053 = vsyncadd (!%p911_p2), %s825_s9, 4294967040  ;;  %p18_p4 = scmp.ge.s32.totalorder %s1142_s24, 4   ;;  %s1637_s18 = smov %s1060_s19 }
 0x451   : > { %s1638_s19 = smov %s1064_s20  ;;  %s1639_s20 = smov %s1154_s27 }
 0x452   : > { %s1640_s21 = smov %s1142_s24  ;;  %20 = sbr.rel (!%p18_p4) target bundleno = 5 (0x5), region = 85 }
 0x459   :  { %830 = vsyncpa [#allocation3], 1 }
 0x45a   :  { %832 = vsyncpa [#allocation3 + $0x1], 1 }
 0x45b   :  { %833 = vsyncpa [#allocation4], 1 }
 0x45c   :  { %835 = vsyncpa [#allocation4 + $0x1], 1 }

</bundles_post_ra>
